<compile_context>
chip_gen: v7x
topology: tpu7x:2x2x1
jax: 0.10.0
libtpu: 0.0.40
codegen_flags: <defaults>
</compile_context>

<pallas_src>
import jax
import jax.numpy as jnp
from jax.experimental import pallas as pl
from jax.experimental.pallas import tpu as pltpu


# ---------------------------------------------------------------------------
# Pass 1: e = exp(x) per tile + global f32 sum accumulated across the grid.
# ---------------------------------------------------------------------------
def _exp_and_sum_kernel(x_ref, e_ref, sum_ref):
    @pl.when(pl.program_id(0) == 0)
    def _init():
        sum_ref[...] = jnp.zeros_like(sum_ref)

    # exp in f32 so the global accumulation stays accurate for bf16 inputs too.
    e = jnp.exp(x_ref[...].astype(jnp.float32))
    sum_ref[...] += jnp.sum(e, keepdims=True)          # (1,1) f32 accumulator
    e_ref[...] = e.astype(e_ref.dtype)


# ---------------------------------------------------------------------------
# Pass 2: out = e * (1 / total). One reciprocal per tile (on a (1,1) value),
# the broadcast multiply lands on the 4-wide VALU. In-place over the exp buf.
# ---------------------------------------------------------------------------
def _scale_kernel(sum_ref, e_ref, o_ref):
    # approx=False keeps full f32 precision; approx=True is available if a
    # looser tolerance is acceptable (it is EUP-slot-free either way per tile).
    inv = pl.reciprocal(sum_ref[...])                  # shape (1, 1)
    o_ref[...] = (e_ref[...].astype(jnp.float32) * inv).astype(o_ref.dtype)


def _choose_row_tile(m: int, n: int, itemsize: int, budget_bytes: int = 2 << 20) -> int:
    """Largest row count that keeps a tile <= budget, divides m, and is a
    multiple of 8 (sublane) — falls back to the full m (single block)."""
    max_rows = max(1, budget_bytes // max(1, n * itemsize))
    if m <= max_rows:
        return m
    for t in range(min(m, max_rows), 0, -1):
        if m % t == 0 and t % 8 == 0:
            return t
    return m


def global_softmax(x: jax.Array, row_tile: int | None = None) -> jax.Array:
    """exp(x) / sum(exp(x)) over the ENTIRE tensor (PyTorch module semantics)."""
    orig_shape = x.shape
    x2 = x.reshape(1, 1) if x.ndim == 0 else x.reshape(-1, x.shape[-1])
    m, n = x2.shape

    tm = row_tile if row_tile is not None else _choose_row_tile(m, n, x2.dtype.itemsize)
    assert m % tm == 0, "row_tile must divide the number of rows"
    grid = (m // tm,)
    nbytes = m * n * x2.dtype.itemsize

    params_pass1 = pltpu.CompilerParams(
        dimension_semantics=("arbitrary",),            # resident sum accumulator
        vmem_limit_bytes=32 * 1024 * 1024,
    )
    params_pass2 = pltpu.CompilerParams(
        dimension_semantics=("parallel",),             # independent tiles (megacore)
        vmem_limit_bytes=32 * 1024 * 1024,
    )

    # ---- Pass 1: exp(x) tiles + global sum --------------------------------
    e, total = pl.pallas_call(
        _exp_and_sum_kernel,
        grid=grid,
        in_specs=[pl.BlockSpec((tm, n), lambda i: (i, 0))],
        out_specs=[
            pl.BlockSpec((tm, n), lambda i: (i, 0)),   # exp(x), lane-dense
            pl.BlockSpec((1, 1), lambda i: (0, 0)),    # global sum (accumulator)
        ],
        out_shape=[
            jax.ShapeDtypeStruct((m, n), x2.dtype),
            jax.ShapeDtypeStruct((1, 1), jnp.float32),
        ],
        compiler_params=params_pass1,
        cost_estimate=pl.CostEstimate(
            flops=m * n, transcendentals=m * n, bytes_accessed=2 * nbytes + 4),
    )(x2)

    # ---- Pass 2: scale by 1/total, reusing the exp buffer ------------------
    out = pl.pallas_call(
        _scale_kernel,
        grid=grid,
        in_specs=[
            pl.BlockSpec((1, 1), lambda i: (0, 0)),
            pl.BlockSpec((tm, n), lambda i: (i, 0)),
        ],
        out_specs=pl.BlockSpec((tm, n), lambda i: (i, 0)),
        out_shape=jax.ShapeDtypeStruct((m, n), x2.dtype),
        input_output_aliases={1: 0},                   # in-place over exp buffer
        compiler_params=params_pass2,
        cost_estimate=pl.CostEstimate(
            flops=m * n, transcendentals=grid[0], bytes_accessed=2 * nbytes),
    )(total, e)

    return out.reshape(orig_shape)


if __name__ == "__main__":
    key = jax.random.PRNGKey(0)
    # Small, lane-aligned shape consistent with the module's elementwise +
    # global-reduction forward; row_tile=16 forces a 4-step grid so the tiled
    # accumulator / two-pass path is actually exercised.
    x = jax.random.normal(key, (64, 128), dtype=jnp.float32)

    out = jax.block_until_ready(global_softmax(x, row_tile=16))

    # Reference (same semantics as the PyTorch module).
    ref = jnp.exp(x) / jnp.sum(jnp.exp(x))
    assert out.shape == x.shape and out.dtype == x.dtype
    assert jnp.allclose(out, ref, rtol=1e-5, atol=1e-8)

    print("KERNEL_OK")
</pallas_src>

<mosaic_0001>
module attributes {stable_mosaic.version = 11 : i64} {
  func.func @_exp_and_sum_kernel(%arg0: i32, %arg1: memref<16x128xf32, #tpu.memory_space<vmem>>, %arg2: memref<16x128xf32, #tpu.memory_space<vmem>>, %arg3: memref<1x1xf32, #tpu.memory_space<vmem>>) attributes {dimension_semantics = [#tpu.dimension_semantics<arbitrary>], iteration_bounds = array<i64: 4>, scalar_prefetch = 0 : i64, scratch_operands = 0 : i64, tpu.core_type = #tpu.core_type<tc>, window_params = [{transform_indices = @transform_0, window_bounds = array<i64: 16, 128>}, {transform_indices = @transform_1, window_bounds = array<i64: 16, 128>}, {pipeline_mode = #tpu.pipeline_mode<synchronous>, transform_indices = @transform_2, window_bounds = array<i64: 1, 1>}]} {
    %c0_i32 = arith.constant 0 : i32
    %0 = arith.cmpi eq, %arg0, %c0_i32 : i32
    %1 = arith.extui %0 : i1 to i32
    %c0_i32_0 = arith.constant 0 : i32
    %2 = arith.cmpi ne, %1, %c0_i32_0 : i32
    scf.if %2 {
      %cst_8 = arith.constant 0.000000e+00 : f32
      %14 = vector.broadcast %cst_8 : f32 to vector<1x1xf32>
      %c0_9 = arith.constant 0 : index
      %c0_10 = arith.constant 0 : index
      %15 = vector.load %arg3[%c0_9, %c0_10] : memref<1x1xf32, #tpu.memory_space<vmem>>, vector<1x1xf32>
      tpu.vector_store %arg3[%c0_9, %c0_10], %14 {strides = array<i32>} : memref<1x1xf32, #tpu.memory_space<vmem>>, vector<1x1xf32>,
    } else {
    }
    %c0 = arith.constant 0 : index
    %c0_1 = arith.constant 0 : index
    %3 = vector.load %arg1[%c0, %c0_1] : memref<16x128xf32, #tpu.memory_space<vmem>>, vector<16x128xf32>
    %4 = math.exp %3 : vector<16x128xf32>
    %c0_2 = arith.constant 0 : index
    %c0_3 = arith.constant 0 : index
    %5 = vector.load %arg3[%c0_2, %c0_3] : memref<1x1xf32, #tpu.memory_space<vmem>>, vector<1x1xf32>
    %6 = vector.shape_cast %4 : vector<16x128xf32> to vector<1x16x128xf32>
    %cst = arith.constant dense<0.000000e+00> : vector<1xf32>
    %7 = vector.multi_reduction <add>, %6, %cst [1, 2] : vector<1x16x128xf32> to vector<1xf32>
    %8 = vector.shape_cast %7 : vector<1xf32> to vector<1x1x1xf32>
    %9 = vector.extract %8[0, 0, 0] : f32 from vector<1x1x1xf32>
    %10 = vector.broadcast %9 : f32 to vector<1x1xf32>
    %11 = arith.addf %5, %10 : vector<1x1xf32>
    %c0_4 = arith.constant 0 : index
    %c0_5 = arith.constant 0 : index
    %12 = vector.load %arg3[%c0_4, %c0_5] : memref<1x1xf32, #tpu.memory_space<vmem>>, vector<1x1xf32>
    tpu.vector_store %arg3[%c0_4, %c0_5], %11 {strides = array<i32>} : memref<1x1xf32, #tpu.memory_space<vmem>>, vector<1x1xf32>,
    %c0_6 = arith.constant 0 : index
    %c0_7 = arith.constant 0 : index
    %13 = vector.load %arg2[%c0_6, %c0_7] : memref<16x128xf32, #tpu.memory_space<vmem>>, vector<16x128xf32>
    tpu.vector_store %arg2[%c0_6, %c0_7], %4 {strides = array<i32>} : memref<16x128xf32, #tpu.memory_space<vmem>>, vector<16x128xf32>,
    return
  }
  func.func @transform_0(%arg0: i32) -> (i32, i32) {
    %c0_i32 = arith.constant 0 : i32
    %c0_i32_0 = arith.constant 0 : i32
    return %arg0, %c0_i32 : i32, i32
  }
  func.func @transform_1(%arg0: i32) -> (i32, i32) {
    %c0_i32 = arith.constant 0 : i32
    %c0_i32_0 = arith.constant 0 : i32
    return %arg0, %c0_i32 : i32, i32
  }
  func.func @transform_2(%arg0: i32) -> (i32, i32) {
    %c0_i32 = arith.constant 0 : i32
    %c0_i32_0 = arith.constant 0 : i32
    %c0_i32_1 = arith.constant 0 : i32
    return %c0_i32, %c0_i32_0 : i32, i32
  }
}

</mosaic_0001>

<bundles_post_ra>
// kernel: tpu_custom_call.1
= control target key start
LH: loop header
LB: loop body
LE: loop exit
PB: predicated region body
PF: predicated region fallthrough
CT: control target
= control target key end

     0   :  { %8 = vsyncpa [#allocation3], 0  ;;  %s720_s0 = inlined_call_operand.hbm [shape: f32[64,128], index: 0, kind: input, shape index: {}]   ;;  %s721_s1 = inlined_call_operand.hbm [shape: f32[64,128], index: 1, kind: output, shape index: {0}]   ;;  %s722_s2 = inlined_call_operand.hbm [shape: f32[1,1], index: 2, kind: output, shape index: {1}]  }
   0x1   :  { %10 = vsyncpa [#allocation3 + $0x1], 0 }
   0x2   :  { %11 = vsyncpa [#allocation4], 0 }
   0x3   :  { %13 = vsyncpa [#allocation4 + $0x1], 0 }
   0x4   :  { %14 = vsyncpa [#allocation7], 0  ;;  %s535_s9 = smov 0   ;;  %s537_s10 = smov 0  }
   0x5   :  { %s539_s11 = smov 0   ;;  %s541_s12 = smov 0  }
   0x6 LB: > { %s556_s13 = sadd.s32 4294967295, %s510_s12   ;;  %s301_s14 = sadd.s32 4294967294, %s510_s12   ;;  %s510_s12 = sphi %s541_s12, %s740_s12   ;;  %s506_s11 = sphi %s539_s11, %s739_s11   ;;  %s502_s10 = sphi %s537_s10, %s738_s10   ;;  %s498_s9 = sphi %s535_s9, %s737_s9  }
   0x7   : > { %s560_s15 = sadd.s32 1, %s510_s12   ;;  %s27_s16 = sadd.s32 1, %s506_s11 }
   0x8   : > { %s24_s17 = ssub.s32 %s510_s12, %s560_s15  ;;  %p34_p0 = scmp.ne.s32.totalorder %s506_s11, %s502_s10 }
   0x9   : > { %p25_p1 = scmp.eq.s32.totalorder %s24_s17, 0  ;;  %p35_p2 = scmp.eq.s32.totalorder %s510_s12, 0 }
   0xa   : > { %p40_p3 = scmp.ne.s32.totalorder %s502_s10, %s498_s9  ;;  %p41_p4 = scmp.eq.s32.totalorder %s556_s13, 0 }
   0xb   : > { %s572_s18 = scalar_select %p25_p1, %s506_s11, %s27_s16  }
   0xc   : > { %p574_p5 = por %p35_p2, %p34_p0  ;;  %p578_p6 = por %p41_p4, %p40_p3 }
   0xd   : > { %p723_p7 = scmp.eq.s32.totalorder %s556_s13, 3  ;;  %p70_p8 = scmp.eq.s32.totalorder %s301_s14, 3 }
   0xe   : > { %p338_p9 = scmp.lt.s32.totalorder %s510_s12, 4  ;;  %s111_s23 = sand.u32 1, %s506_s11  }
   0xf   : > { %p586_p10 = por %p723_p7, %p34_p0  ;;  %p590_p11 = por %p70_p8, %p40_p3 }
  0x10   : > { %s318_s24 = sshll.u32 %s510_s12, 8  ;;  %s304_s25 = sshll.u32 %s111_s23, 4 }
  0x11   : > { %s727_s21 = scalar_select %p586_p10, 1, 0 }
  0x12   : > { %s728_s22 = scalar_select %p590_p11, 1, 0 }
  0x13   : > { %s599_s28 = scalar_lea.hbm %s720_s0, %s318_s24  ;;  %s115_s29 = scalar_lea.vmem [#allocation2], %s304_s25 }
  0x14   : > { %s122_s30 = sshll.u32 %s115_s29, 4  ;;  %p603_p12 = pnand %p338_p9, %p574_p5  ;;  %s607_s30 = int_to_ptr.vmem [resolvable:$true] %s122_s30 }
  0x15   : > { %s609_s4 = scalar_lea.sflag [#allocation3], %s111_s23  ;;  %s384_s5 = scalar_lea.hbm %s599_s28, 256 }
  0x16   : > { %p385_p13 = scmp.ne.s32.totalorder %s599_s28, %s384_s5  ;;  %p386_p0 = pneg %p603_p12 }
  0x17   : > { %s389_s8 = scalar_lea.hbm %s720_s0, 1024  ;;  %p390_p3 = scmp.lt.u32.totalorder %s599_s28, %s720_s0 }
  0x18   : > { %p387_p1 = pnand %p386_p0, %p385_p13  ;;  %p391_p4 = scmp.lt.u32.totalorder %s389_s8, %s384_s5 }
  0x19   : > { %p393_p8 = scmp.lt.u32.totalorder %s384_s5, %s599_s28 }
  0x1a   : > { %p388_p2 = pneg %p387_p1  ;;  %p392_p5 = por %p391_p4, %p390_p3 }
  0x1c   : > { %p394_p9 = por %p393_p8, %p392_p5 }
  0x1e   : > { %p395_p7 = pnand %p394_p9, %p388_p2 }
  0x20   : > { %398 = shalt.err (!%p395_p7)
}
  0x21   : > { %s399_s17 = scalar_lea.vmem %s607_s30, 256  ;;  %s512_s19 = smov [#allocation2]  }
  0x22   : > { %p400_p13 = scmp.ne.s32.totalorder %s607_s30, %s399_s17  ;;  %s404_s23 = sshll.u32 %s512_s19, 4  ;;  %s405_s23 = int_to_ptr.vmem [resolvable:$false] %s404_s23 }
  0x23   : > { %s406_s24 = scalar_lea.vmem %s405_s23, 512  ;;  %p407_p10 = scmp.lt.s32.totalorder %s607_s30, %s405_s23 }
  0x24   : > { %p402_p1 = pnand %p400_p13, %p386_p0  ;;  %p408_p3 = scmp.lt.s32.totalorder %s406_s24, %s399_s17 }
  0x26   : > { %p403_p11 = pneg %p402_p1  ;;  %p409_p4 = por %p408_p3, %p407_p10 }
  0x28   : > { %p410_p5 = pnand %p409_p4, %p403_p11 }
  0x2a   : > { %413 = shalt.err (!%p410_p5)
}
  0x2b   : > { %s513_s25 = smov 128   ;;  %s514_s26 = smov 8  }
  0x2c   : > { %333 = dma.hbm_to_vmem [thread:$0]  (!%p603_p12), %s599_s28, 256, %s607_s30, %s609_s4, %s513_s25, %s513_s25, %s514_s26  }
  0x2d   : > { %p307_p7 = scmp.ge.s32.totalorder %s510_s12, 1  ;;  %p130_p0 = scmp.lt.s32.totalorder %s510_s12, 5 }
  0x2f   : > { %p131_p2 = pnand %p307_p7, %p130_p0 }
  0x30   : > { %s640_s27 = sand.u32 (!%p131_p2), 1, %s502_s10  }
  0x31   : > { %134 = sbr.rel (%p131_p2) target bundleno = 308 (0x134), region = 24  ;;  %s308_s29 = sshll.u32 (!%p131_p2), %s640_s27, 4 }
  0x32   : > { %s137_s5 = scalar_lea.sflag (!%p131_p2), [#allocation3], %s640_s27  ;;  %s140_s6 = scalar_lea.vmem (!%p131_p2), [#allocation2], %s308_s29 }
  0x38   : > { %485 = dma.done.wait (%p578_p6), %s137_s5, 256  }
  0x39   : > { %487 = vsyncadd (%p578_p6), %s137_s5, 4294967040  ;;  %s158_s3 = scalar_lea.vmem [#allocation5], %s308_s29  ;;  %p310_p10 = scmp.ne.s32.totalorder %s556_s13, 0 }
  0x3a   : > { %vm167_vm0 = vcmask (!%p310_p10), 0   ;;  %v515_v0 = vmov (!%p310_p10), 0.0  }
  0x3b   : > { %166 = sbr.rel (%p310_p10) target bundleno = 66 (0x42), region = 32  ;;  %168 = vst.msk [vmem:[#allocation6] sm:$0x1] (!%p310_p10), %vm167_vm0, %v515_v0 }
  0x42 PF: > { %v169_v1 = vld [vmem:[%s140_s6] sm:$0xff]  ;;  %v170_v2 = vld [vmem:[%s140_s6 + $0x8] sm:$0xff]  ;;  %s319_s20 = sshll.u32 %s556_s13, 8  ;;  %s206_s7 = sshll.u32 %s158_s3, 4  ;;  %s655_s7 = int_to_ptr.vmem [resolvable:$true] %s206_s7 }
  0x43   : > { %v171_v3 = vmul.f32 1.442695, %v169_v1  ;;  %v173_v4 = vmul.f32 1.442695, %v170_v2  ;;  %s653_s4 = scalar_lea.hbm %s721_s1, %s319_s20  ;;  %s193_s8 = scalar_lea.sflag [#allocation4], %s640_s27 }
  0x44   : > { %s414_s14 = scalar_lea.vmem %s655_s7, 256  ;;  %p730_p11 = scmp.ne.s32.totalorder %s727_s21, 0 }
  0x45   : > { %380 = vpow2.f32 %v171_v3  ;;  %p415_p6 = scmp.ne.s32.totalorder %s655_s7, %s414_s14  ;;  %s516_s16 = smov [#allocation5]  }
  0x46   : > { %382 = vpow2.f32 %v173_v4  ;;  %s418_s17 = sshll.u32 %s516_s16, 4  ;;  %s419_s17 = int_to_ptr.vmem [resolvable:$false] %s418_s17 }
  0x47   : > { %p416_p12 = pnand %p415_p6, %p730_p11  ;;  %s420_s19 = scalar_lea.vmem %s419_s17, 512 }
  0x48   : > { %p421_p9 = scmp.lt.s32.totalorder %s655_s7, %s419_s17  ;;  %p422_p13 = scmp.lt.s32.totalorder %s420_s19, %s414_s14 }
  0x49   : > { %p417_p8 = pneg %p416_p12 }
  0x4a   : > { %p423_p1 = por %p422_p13, %p421_p9 }
  0x4c   : > { %p424_p3 = pnand %p423_p1, %p417_p8 }
  0x4f   : > { %v381_v5 = vpop.eup %380 }
  0x50   : > { %v383_v6 = vpop.eup %382  ;;  %190 = vst [vmem:[%s158_s3] sm:$0xff] %v381_v5 }
  0x51   : > { %v176_v7 = vadd.f32 %v383_v6, %v381_v5  ;;  %191 = vst [vmem:[%s158_s3 + $0x8] sm:$0xff] %v383_v6 }
  0x53   : > { %177 = vadd.xlane.f32.xlu0 %v176_v7 }
  0x54   : > { %427 = shalt.err (!%p424_p3)
}
  0x55   : > { %s428_s23 = scalar_lea.hbm %s653_s4, 256  ;;  %s432_s26 = scalar_lea.hbm %s721_s1, 1024 }
  0x56   : > { %p429_p4 = scmp.ne.s32.totalorder %s653_s4, %s428_s23  ;;  %p433_p0 = scmp.lt.u32.totalorder %s653_s4, %s721_s1 }
  0x57   : > { %p434_p2 = scmp.lt.u32.totalorder %s432_s26, %s428_s23  ;;  %p436_p6 = scmp.lt.u32.totalorder %s428_s23, %s653_s4 }
  0x58   : > { %p430_p5 = pnand %p429_p4, %p730_p11 }
  0x59   : > { %p435_p10 = por %p434_p2, %p433_p0 }
  0x5a   : > { %p431_p7 = pneg %p430_p5 }
  0x5b   : > { %p437_p12 = por %p436_p6, %p435_p10 }
  0x5d   : > { %p438_p8 = pnand %p437_p12, %p431_p7 }
  0x5f   : > { %441 = shalt.err (!%p438_p8)
}
  0x60   : > { %s517_s6 = smov 128   ;;  %s518_s3 = smov 8   ;;  %v175_v15 = vld [vmem:[#allocation6] sm:$0x1]  ;;  %vm188_vm1 = vcmask 0  }
  0x61   : > { %324 = dma.vmem_to_hbm [thread:$0]  (%p730_p11), %s655_s7, 256, %s653_s4, %s193_s8, %s517_s6, %s517_s6, %s518_s3  }
  0x62   : > { %s519_s20 = smov [#allocation6]   ;;  %p731_p9 = scmp.eq.s32.totalorder %s556_s13, 3 }
  0x63   : > { %s220_s28 = sshll.u32 %s519_s20, 4  ;;  %s221_s28 = int_to_ptr.vmem [resolvable:$true] %s220_s28 }
  0x64   : > { %s442_s21 = scalar_lea.vmem %s221_s28, 16  ;;  %s448_s27 = scalar_lea.vmem %s221_s28, 32 }
  0x65   : > { %p443_p11 = scmp.ne.s32.totalorder %s221_s28, %s442_s21  ;;  %p449_p3 = scmp.lt.s32.totalorder %s221_s28, %s221_s28 }
  0x66   : > { %p450_p4 = scmp.lt.s32.totalorder %s448_s27, %s442_s21 }
  0x67   : > { %p444_p13 = pnand %p443_p11, %p731_p9 }
  0x68   : > { %p451_p5 = por %p450_p4, %p449_p3 }
  0x69   : > { %p445_p1 = pneg %p444_p13 }
  0x6b   : > { %p452_p7 = pnand %p451_p5, %p445_p1 }
  0xe0   : > { %v178_v8 = vpop.xlane.xlu0 %177 }
  0xe1   : > { %v179_v9 = vrot.slane %v178_v8, 4 }
  0xe3   : > { %v180_v10 = vadd.f32 %v179_v9, %v178_v8 }
  0xe5   : > { %v181_v11 = vrot.slane %v180_v10, 2 }
  0xe7   : > { %v182_v12 = vadd.f32 %v181_v11, %v180_v10 }
  0xe9   : > { %v183_v13 = vrot.slane %v182_v12, 1 }
  0xeb   : > { %v184_v14 = vadd.f32 %v183_v13, %v182_v12 }
  0xed   : > { %320 = vpush %v184_v14 }
 0x11e   : > { %s321_s30 = spop %320 }
 0x11f   : > { %v186_v16 = vstv %s321_s30 }
 0x120   : > { %v187_v17 = vadd.f32 %v186_v16, %v175_v15 }
 0x122   : > { %189 = vst.msk [vmem:[#allocation6] sm:$0x1] %vm188_vm1, %v187_v17 }
 0x123   : > { %455 = shalt.err (!%p452_p7)
}
 0x124   : > { %s456_s8 = scalar_lea.hbm %s722_s2, 16  ;;  %p732_p2 = pmov %p731_p9 }
 0x125   : > { %p457_p0 = scmp.ne.s32.totalorder %s722_s2, %s456_s8  ;;  %p462_p12 = scmp.lt.u32.totalorder %s456_s8, %s722_s2 }
 0x127   : > { %p458_p10 = pnand %p457_p0, %p732_p2 }
 0x129   : > { %p459_p6 = pneg %p458_p10 }
 0x12b   : > { %p464_p8 = pnand %p462_p12, %p459_p6 }
 0x12d   : > { %467 = shalt.err (!%p464_p8)
}
 0x12e   : > { %p733_p11 = pmov %p732_p2  ;;  %p734_p9 = pmov %p732_p2 }
 0x130   : > { %326 = dma.vmem_to_hbm [thread:$0]  (%p733_p11), %s221_s28, 16, %s722_s2, [#allocation7]  }
 0x131   : > { %489 = dma.done.wait (%p734_p9), [#allocation7], 16   ;;  %p735_p13 = pmov %p732_p2 }
 0x133   : > { %491 = vsyncadd (%p735_p13), [#allocation7], 4294967280 }
 0x134 PF: > { %p341_p1 = scmp.ge.s32.totalorder %s510_s12, 2  ;;  %s236_s25 = sand.u32 1, %s498_s9  }
 0x135   : > { %p736_p3 = scmp.ne.s32.totalorder %s728_s22, 0  ;;  %s237_s26 = scalar_lea.sflag [#allocation4], %s236_s25 }
 0x137   : > { %p335_p4 = pnand %p341_p1, %p736_p3 }
 0x139   : > { %493 = dma.done.wait (!%p335_p4), %s237_s26, 256  }
 0x13a   : > { %495 = vsyncadd (!%p335_p4), %s237_s26, 4294967040  ;;  %p17_p5 = scmp.ge.s32.totalorder %s560_s15, 6   ;;  %s737_s9 = smov %s502_s10 }
 0x13b   : > { %s738_s10 = smov %s506_s11  ;;  %s739_s11 = smov %s572_s18 }
 0x13c   : > { %s740_s12 = smov %s560_s15  ;;  %19 = sbr.rel (!%p17_p5) target bundleno = 6 (0x6), region = 81 }
 0x143   :  { %242 = vsyncpa [#allocation3], 1 }
 0x144   :  { %244 = vsyncpa [#allocation3 + $0x1], 1 }
 0x145   :  { %245 = vsyncpa [#allocation4], 1 }
 0x146   :  { %247 = vsyncpa [#allocation4 + $0x1], 1 }
 0x147   :  { %248 = vsyncpa [#allocation7], 1 }

</bundles_post_ra>
